<compile_context>
chip_gen: v5e
topology: v5e:2x2
jax: 0.10.0
libtpu: 0.0.40
codegen_flags: <defaults>
</compile_context>

<pallas_src>
import functools

import jax
import jax.numpy as jnp
import numpy as np
from jax import lax
from jax.experimental import pallas as pl
from jax.experimental.pallas import tpu as pltpu


# ----------------------------- Pallas kernel --------------------------------

def _sym_reflexion_kernel(planes_ref, pts_ref, cp_ref, out_ref, *,
                          res, heads_per_batch, n_valid, n_pad, bb, chunk):
    """Per-program reflection-symmetry distance loss (bb batches x C heads).

    planes_ref : (4, M)        f32 VMEM -- plane params broadcast per column
    pts_ref    : (3, M)        f32 VMEM -- points tiled per head (zero padded)
    cp_ref     : (bb, 3R, R^2) f32 VMEM -- cp grid, row = coord*R + z, col = x*R + y
    out_ref    : (bb*C, 1)     f32 VMEM -- per-(batch-in-block, head) mean distance
    where M = bb * C * n_pad; columns ordered (batch-in-block, head, point).
    """
    R = res
    C = heads_per_batch
    M = bb * C * n_pad
    n_chunks = M // chunk
    f32 = jnp.float32

    # Hoisted iotas, reused by every chunk (JAX does not CSE broadcast_in_dim).
    xy_row = lax.broadcasted_iota(jnp.int32, (R * R, chunk), 0)
    z_row = lax.broadcasted_iota(jnp.int32, (R, chunk), 0)
    lane = lax.broadcasted_iota(jnp.int32, (1, chunk), 1)

    # bf16 copy of the cp grid: native MXU input dtype on v5e/v6e/v7x.
    cp_bf = [cp_ref[i].astype(jnp.bfloat16) for i in range(bb)]

    dist_chunks = []
    for t in range(n_chunks):                 # static trip count (fully unrolled)
        g0 = t * chunk                        # chunk | n_pad -> one (batch, head) per chunk
        bidx = g0 // (C * n_pad)              # batch within this program (static)
        l0 = g0 % n_pad                       # offset within the head (static)

        p = planes_ref[:, g0:g0 + chunk]      # (4, chunk)
        x = pts_ref[:, g0:g0 + chunk]         # (3, chunk)

        nrm = p[0:3, :]
        off = p[3:4, :]                       # raw offset, as in the torch module
        n_hat = nrm * lax.rsqrt(jnp.sum(nrm * nrm, axis=0, keepdims=True))

        # Householder reflection through the plane.
        dist = jnp.sum(x * n_hat, axis=0, keepdims=True) + off
        refl = x - 2.0 * dist * n_hat         # (3, chunk)

        # Voxel index of the reflected point (floor, clamped to the grid).
        vox = jnp.clip(jnp.floor(refl * float(R)), 0.0, float(R - 1)).astype(jnp.int32)
        xy = vox[0:1, :] * R + vox[1:2, :]    # (1, chunk)
        zz = vox[2:3, :]                      # (1, chunk)

        # Stage 1: gather the (x, y) slab with one lane-dense bf16 MXU matmul.
        onehot_xy = (xy_row == xy).astype(jnp.bfloat16)              # (R^2, chunk)
        slabs = jnp.dot(cp_bf[bidx], onehot_xy,
                        preferred_element_type=f32)                  # (3R, chunk)

        # Stage 2: z selection with a 0/1 mask + sublane reduce (no 2nd matmul).
        zmask = (z_row == zz).astype(f32)                            # (R, chunk)
        cp_x = jnp.sum(slabs[0:R, :] * zmask, axis=0, keepdims=True)
        cp_y = jnp.sum(slabs[R:2 * R, :] * zmask, axis=0, keepdims=True)
        cp_z = jnp.sum(slabs[2 * R:3 * R, :] * zmask, axis=0, keepdims=True)

        dx = refl[0:1, :] - cp_x
        dy = refl[1:2, :] - cp_y
        dz = refl[2:3, :] - cp_z
        pdist = jnp.sqrt(dx * dx + dy * dy + dz * dz)                # (1, chunk)

        # Zero padded point columns so they never reach the reduction.
        valid = (lane < (n_valid - l0)).astype(f32)
        dist_chunks.append(pdist * valid)

    dist_row = dist_chunks[0] if n_chunks == 1 else jnp.concatenate(dist_chunks, axis=1)

    # Per-(batch, head) mean via a head mask + lane reduction.
    H = bb * C
    col = lax.broadcasted_iota(jnp.int32, (H, M), 1)
    row = lax.broadcasted_iota(jnp.int32, (H, M), 0)
    head_mask = jnp.logical_and(col >= row * n_pad,
                                col < (row + 1) * n_pad).astype(f32)
    per_head = jnp.sum(head_mask * dist_row, axis=1, keepdims=True) * (1.0 / n_valid)
    out_ref[...] = per_head


# ------------------------------- wrapper -------------------------------------

def sym_loss(predicted_planes, sample_points, voxel_grids, cp_grids, reg_coef,
             *, batches_per_program=None, lane_chunk=None):
    """Pallas implementation of SymLoss.forward. Returns a shape-(1,) f32 array."""
    del voxel_grids  # is_voxel_filled never contributes to the torch loss value
    B, C, _ = predicted_planes.shape
    N = sample_points.shape[1]
    R = cp_grids.shape[1]

    n_pad = ((N + 127) // 128) * 128          # full 128-lane tiles, unmasked stores

    # Batch blocking: fold `bb` batches into one program's lane axis (v5e/v6e
    # overhead amortization) while keeping >= 2 programs for the two v7x TCs.
    if batches_per_program is None:
        bb = 1
        while (B % (2 * bb) == 0 and B // (2 * bb) >= 2
               and 2 * bb * C * n_pad <= 4096):
            bb *= 2
    else:
        bb = int(batches_per_program)
    assert B % bb == 0, (B, bb)
    n_prog = B // bb
    m_prog = bb * C * n_pad
    n_heads_prog = bb * C

    if lane_chunk is None:
        chunk = 128
        for cand in (512, 256, 128):
            if n_pad % cand == 0:
                chunk = cand
                break
    else:
        chunk = int(lane_chunk)
    assert chunk % 128 == 0 and n_pad % chunk == 0, (chunk, n_pad)

    planes = predicted_planes.astype(jnp.float32)                     # (B, C, 4)
    pts = sample_points.astype(jnp.float32)                           # (B, N, 3)
    cps = cp_grids.astype(jnp.float32)                                # (B, R, R, R, 3)

    # Pre-broadcast planes to one column per (head, point): (B, 4, C*n_pad).
    planes_t = jnp.transpose(planes, (0, 2, 1))                       # (B, 4, C)
    planes_bc = jnp.broadcast_to(planes_t[:, :, :, None],
                                 (B, 4, C, n_pad)).reshape(B, 4, C * n_pad)

    # Pre-tile points per head (zero-padded to n_pad): (B, 3, C*n_pad).
    pts_t = jnp.transpose(pts, (0, 2, 1))                             # (B, 3, N)
    pts_t = jnp.pad(pts_t, ((0, 0), (0, 0), (0, n_pad - N)))
    pts_tiled = jnp.tile(pts_t, (1, 1, C))                            # (B, 3, C*n_pad)

    # cp grid: (b, x, y, z, c) -> (b, c, z, x, y) -> (B, 3R, R^2),
    # row = coord*R + z, col = x*R + y.
    cp_mat = jnp.transpose(cps, (0, 4, 3, 1, 2)).reshape(B, 3 * R, R * R)

    # Fold bb batches into the lane axis (columns ordered batch-major, then head).
    planes_fold = planes_bc.reshape(n_prog, bb, 4, C * n_pad) \
                           .transpose(0, 2, 1, 3).reshape(n_prog, 4, m_prog)
    pts_fold = pts_tiled.reshape(n_prog, bb, 3, C * n_pad) \
                        .transpose(0, 2, 1, 3).reshape(n_prog, 3, m_prog)
    cp_fold = cp_mat.reshape(n_prog, bb, 3 * R, R * R)

    per_head = pl.pallas_call(
        functools.partial(_sym_reflexion_kernel, res=R, heads_per_batch=C,
                          n_valid=N, n_pad=n_pad, bb=bb, chunk=chunk),
        out_shape=jax.ShapeDtypeStruct((n_prog, n_heads_prog, 1), jnp.float32),
        grid=(n_prog,),
        in_specs=[
            pl.BlockSpec((None, 4, m_prog), lambda b: (b, 0, 0)),
            pl.BlockSpec((None, 3, m_prog), lambda b: (b, 0, 0)),
            pl.BlockSpec((None, bb, 3 * R, R * R), lambda b: (b, 0, 0, 0)),
        ],
        out_specs=pl.BlockSpec((None, n_heads_prog, 1), lambda b: (b, 0, 0)),
        compiler_params=pltpu.CompilerParams(
            dimension_semantics=("parallel",),
            vmem_limit_bytes=16 * 1024 * 1024,
        ),
    )(planes_fold, pts_fold, cp_fold)

    reflexion = jnp.sum(per_head)

    # Orthogonality regularizer: C x C Gram per batch -- tiny, plain JAX (no kernel).
    normals = planes[:, :, :3]
    nh = normals / jnp.linalg.norm(normals, axis=2, keepdims=True)
    gram = jnp.einsum('bcd,bed->bce', nh, nh) - jnp.eye(C, dtype=jnp.float32)
    reg = jnp.sum(jnp.sqrt(jnp.sum(gram * gram, axis=(1, 2))))

    total = reflexion + jnp.float32(reg_coef) * reg
    return total.reshape(1)


# --------------------------- pure-JAX reference -------------------------------

def _ref_sym_loss(planes, pts, voxel_grids, cps, reg_coef):
    del voxel_grids
    B, C, _ = planes.shape
    R = cps.shape[1]

    n = planes[:, :, :3]
    nh = n / jnp.linalg.norm(n, axis=2, keepdims=True)
    gram = jnp.einsum('bcd,bed->bce', nh, nh) - jnp.eye(C, dtype=jnp.float32)
    reg = jnp.sum(jnp.sqrt(jnp.sum(gram * gram, axis=(1, 2))))

    total = jnp.float32(0.0)
    for b in range(B):
        for c in range(C):
            pn = planes[b, c, :3]
            nhat = pn / jnp.sqrt(jnp.sum(pn * pn))
            d = planes[b, c, 3]
            p = pts[b]
            dist = jnp.sum(p * nhat[None, :], axis=1, keepdims=True) + d
            refl = p - 2.0 * dist * nhat[None, :]
            vl = 1.0 / R
            vidx = jnp.clip(jnp.floor(refl / vl), 0, R - 1).astype(jnp.int32)
            cp = cps[b][vidx[:, 0], vidx[:, 1], vidx[:, 2], :]
            diff = refl - cp
            total = total + jnp.mean(jnp.sqrt(jnp.sum(diff * diff, axis=1)))
    return (total + reg_coef * reg).reshape(1)


# ---------------------------------- main --------------------------------------

if __name__ == "__main__":
    B, C, N, R = 2, 3, 64, 8
    reg_coef = 25.0

    key = jax.random.PRNGKey(0)
    kp, ks, kc, kv = jax.random.split(key, 4)
    predicted_planes = jax.random.normal(kp, (B, C, 4), dtype=jnp.float32)
    sample_points = jax.random.uniform(ks, (B, N, 3), dtype=jnp.float32)
    cp_grids = jax.random.uniform(kc, (B, R, R, R, 3), dtype=jnp.float32)
    voxel_grids = (jax.random.uniform(kv, (B, 1, R, R, R)) > 0.5).astype(jnp.float32)

    ref = jax.block_until_ready(
        _ref_sym_loss(predicted_planes, sample_points, voxel_grids, cp_grids, reg_coef))

    # Default config: one batch per program (2 programs -> both v7x TCs busy).
    out = jax.block_until_ready(
        sym_loss(predicted_planes, sample_points, voxel_grids, cp_grids, reg_coef))
    assert out.shape == (1,)
    assert np.allclose(np.asarray(out), np.asarray(ref), rtol=1e-2, atol=1e-2), (out, ref)

    # Batch-blocked config (both batches folded into one program's lane axis),
    # exercising the v5e/v6e-oriented path.
    out_bb = jax.block_until_ready(
        sym_loss(predicted_planes, sample_points, voxel_grids, cp_grids, reg_coef,
                 batches_per_program=2))
    assert out_bb.shape == (1,)
    assert np.allclose(np.asarray(out_bb), np.asarray(ref), rtol=1e-2, atol=1e-2), (out_bb, ref)

    print("KERNEL_OK")
</pallas_src>

<mosaic_0001>
module attributes {stable_mosaic.version = 11 : i64} {
  func.func @_sym_reflexion_kernel(%arg0: i32, %arg1: memref<1x4x384xf32, #tpu.memory_space<vmem>>, %arg2: memref<1x3x384xf32, #tpu.memory_space<vmem>>, %arg3: memref<1x1x24x64xf32, #tpu.memory_space<vmem>>, %arg4: memref<1x3x1xf32, #tpu.memory_space<vmem>>) attributes {dimension_semantics = [#tpu.dimension_semantics<parallel>], iteration_bounds = array<i64: 2>, scalar_prefetch = 0 : i64, scratch_operands = 0 : i64, tpu.core_type = #tpu.core_type<tc>, window_params = [{transform_indices = @transform_0, window_bounds = array<i64: 1, 4, 384>}, {transform_indices = @transform_1, window_bounds = array<i64: 1, 3, 384>}, {transform_indices = @transform_2, window_bounds = array<i64: 1, 1, 24, 64>}, {transform_indices = @transform_3, window_bounds = array<i64: 1, 3, 1>}]} {
    %0 = tpu.iota {dimensions = array<i32: 0>} : vector<64x128xi32>
    %1 = tpu.iota {dimensions = array<i32: 0>} : vector<8x128xi32>
    %2 = tpu.iota {dimensions = array<i32: 1>} : vector<1x128xi32>
    %c0 = arith.constant 0 : index
    %c0_0 = arith.constant 0 : index
    %c0_1 = arith.constant 0 : index
    %c0_2 = arith.constant 0 : index
    %3 = vector.load %arg3[%c0, %c0_0, %c0_1, %c0_2] : memref<1x1x24x64xf32, #tpu.memory_space<vmem>>, vector<1x1x24x64xf32>
    %4 = vector.shape_cast %3 : vector<1x1x24x64xf32> to vector<24x64xf32>
    %5 = arith.truncf %4 : vector<24x64xf32> to vector<24x64xbf16>
    %c0_3 = arith.constant 0 : index
    %c0_4 = arith.constant 0 : index
    %c0_5 = arith.constant 0 : index
    %6 = vector.load %arg1[%c0_3, %c0_4, %c0_5] : memref<1x4x384xf32, #tpu.memory_space<vmem>>, vector<1x4x128xf32>
    %7 = vector.shape_cast %6 : vector<1x4x128xf32> to vector<4x128xf32>
    %c0_6 = arith.constant 0 : index
    %c0_7 = arith.constant 0 : index
    %c0_8 = arith.constant 0 : index
    %8 = vector.load %arg2[%c0_6, %c0_7, %c0_8] : memref<1x3x384xf32, #tpu.memory_space<vmem>>, vector<1x3x128xf32>
    %9 = vector.shape_cast %8 : vector<1x3x128xf32> to vector<3x128xf32>
    %10 = vector.extract_strided_slice %7 {offsets = [0, 0], sizes = [3, 128], strides = [1, 1]} : vector<4x128xf32> to vector<3x128xf32>
    %11 = vector.extract_strided_slice %7 {offsets = [3, 0], sizes = [1, 128], strides = [1, 1]} : vector<4x128xf32> to vector<1x128xf32>
    %12 = arith.mulf %10, %10 : vector<3x128xf32>
    %cst = arith.constant dense<0.000000e+00> : vector<128xf32>
    %13 = vector.multi_reduction <add>, %12, %cst [0] : vector<3x128xf32> to vector<128xf32>
    %14 = vector.shape_cast %13 : vector<128xf32> to vector<1x128xf32>
    %15 = math.rsqrt %14 : vector<1x128xf32>
    %16 = vector.broadcast %15 : vector<1x128xf32> to vector<3x128xf32>
    %17 = arith.mulf %10, %16 : vector<3x128xf32>
    %18 = arith.mulf %9, %17 : vector<3x128xf32>
    %cst_9 = arith.constant dense<0.000000e+00> : vector<128xf32>
    %19 = vector.multi_reduction <add>, %18, %cst_9 [0] : vector<3x128xf32> to vector<128xf32>
    %20 = vector.shape_cast %19 : vector<128xf32> to vector<1x128xf32>
    %21 = arith.addf %20, %11 : vector<1x128xf32>
    %cst_10 = arith.constant 2.000000e+00 : f32
    %22 = vector.broadcast %cst_10 : f32 to vector<1x128xf32>
    %23 = arith.mulf %22, %21 : vector<1x128xf32>
    %24 = vector.broadcast %23 : vector<1x128xf32> to vector<3x128xf32>
    %25 = arith.mulf %24, %17 : vector<3x128xf32>
    %26 = arith.subf %9, %25 : vector<3x128xf32>
    %cst_11 = arith.constant 8.000000e+00 : f32
    %27 = vector.broadcast %cst_11 : f32 to vector<3x128xf32>
    %28 = arith.mulf %26, %27 : vector<3x128xf32>
    %29 = math.floor %28 : vector<3x128xf32>
    %cst_12 = arith.constant 0.000000e+00 : f32
    %cst_13 = arith.constant 7.000000e+00 : f32
    %30 = vector.broadcast %cst_12 : f32 to vector<3x128xf32>
    %31 = arith.maximumf %30, %29 : vector<3x128xf32>
    %32 = vector.broadcast %cst_13 : f32 to vector<3x128xf32>
    %33 = arith.minimumf %32, %31 : vector<3x128xf32>
    %34 = arith.fptosi %33 : vector<3x128xf32> to vector<3x128xi32>
    %35 = vector.extract_strided_slice %34 {offsets = [0, 0], sizes = [1, 128], strides = [1, 1]} : vector<3x128xi32> to vector<1x128xi32>
    %c8_i32 = arith.constant 8 : i32
    %36 = vector.broadcast %c8_i32 : i32 to vector<1x128xi32>
    %37 = arith.muli %35, %36 : vector<1x128xi32>
    %38 = vector.extract_strided_slice %34 {offsets = [1, 0], sizes = [1, 128], strides = [1, 1]} : vector<3x128xi32> to vector<1x128xi32>
    %39 = arith.addi %37, %38 : vector<1x128xi32>
    %40 = vector.extract_strided_slice %34 {offsets = [2, 0], sizes = [1, 128], strides = [1, 1]} : vector<3x128xi32> to vector<1x128xi32>
    %41 = vector.broadcast %39 : vector<1x128xi32> to vector<64x128xi32>
    %42 = arith.cmpi eq, %0, %41 : vector<64x128xi32>
    %43 = arith.extui %42 : vector<64x128xi1> to vector<64x128xi32>
    %44 = arith.sitofp %43 : vector<64x128xi32> to vector<64x128xf32>
    %45 = arith.truncf %44 : vector<64x128xf32> to vector<64x128xbf16>
    %cst_14 = arith.constant dense<0.000000e+00> : vector<24x128xf32>
    %46 = tpu.matmul %5, %45, %cst_14 {dimension_numbers = #tpu.dot_dimension_numbers<[1], [0], [0], [1], [0, 0, 1, 1], [], []>} : vector<24x64xbf16>, vector<64x128xbf16>, vector<24x128xf32> -> vector<24x128xf32>
    %47 = vector.broadcast %40 : vector<1x128xi32> to vector<8x128xi32>
    %48 = arith.cmpi eq, %1, %47 : vector<8x128xi32>
    %49 = arith.extui %48 : vector<8x128xi1> to vector<8x128xi32>
    %50 = arith.sitofp %49 : vector<8x128xi32> to vector<8x128xf32>
    %51 = vector.extract_strided_slice %46 {offsets = [0, 0], sizes = [8, 128], strides = [1, 1]} : vector<24x128xf32> to vector<8x128xf32>
    %52 = arith.mulf %51, %50 : vector<8x128xf32>
    %cst_15 = arith.constant dense<0.000000e+00> : vector<128xf32>
    %53 = vector.multi_reduction <add>, %52, %cst_15 [0] : vector<8x128xf32> to vector<128xf32>
    %54 = vector.shape_cast %53 : vector<128xf32> to vector<1x128xf32>
    %55 = vector.extract_strided_slice %46 {offsets = [8, 0], sizes = [8, 128], strides = [1, 1]} : vector<24x128xf32> to vector<8x128xf32>
    %56 = arith.mulf %55, %50 : vector<8x128xf32>
    %cst_16 = arith.constant dense<0.000000e+00> : vector<128xf32>
    %57 = vector.multi_reduction <add>, %56, %cst_16 [0] : vector<8x128xf32> to vector<128xf32>
    %58 = vector.shape_cast %57 : vector<128xf32> to vector<1x128xf32>
    %59 = vector.extract_strided_slice %46 {offsets = [16, 0], sizes = [8, 128], strides = [1, 1]} : vector<24x128xf32> to vector<8x128xf32>
    %60 = arith.mulf %59, %50 : vector<8x128xf32>
    %cst_17 = arith.constant dense<0.000000e+00> : vector<128xf32>
    %61 = vector.multi_reduction <add>, %60, %cst_17 [0] : vector<8x128xf32> to vector<128xf32>
    %62 = vector.shape_cast %61 : vector<128xf32> to vector<1x128xf32>
    %63 = vector.extract_strided_slice %26 {offsets = [0, 0], sizes = [1, 128], strides = [1, 1]} : vector<3x128xf32> to vector<1x128xf32>
    %64 = arith.subf %63, %54 : vector<1x128xf32>
    %65 = vector.extract_strided_slice %26 {offsets = [1, 0], sizes = [1, 128], strides = [1, 1]} : vector<3x128xf32> to vector<1x128xf32>
    %66 = arith.subf %65, %58 : vector<1x128xf32>
    %67 = vector.extract_strided_slice %26 {offsets = [2, 0], sizes = [1, 128], strides = [1, 1]} : vector<3x128xf32> to vector<1x128xf32>
    %68 = arith.subf %67, %62 : vector<1x128xf32>
    %69 = arith.mulf %64, %64 : vector<1x128xf32>
    %70 = arith.mulf %66, %66 : vector<1x128xf32>
    %71 = arith.addf %69, %70 : vector<1x128xf32>
    %72 = arith.mulf %68, %68 : vector<1x128xf32>
    %73 = arith.addf %71, %72 : vector<1x128xf32>
    %74 = math.sqrt %73 : vector<1x128xf32>
    %c64_i32 = arith.constant 64 : i32
    %75 = vector.broadcast %c64_i32 : i32 to vector<1x128xi32>
    %76 = arith.cmpi slt, %2, %75 : vector<1x128xi32>
    %77 = arith.extui %76 : vector<1x128xi1> to vector<1x128xi32>
    %78 = arith.sitofp %77 : vector<1x128xi32> to vector<1x128xf32>
    %79 = arith.mulf %74, %78 : vector<1x128xf32>
    %c0_18 = arith.constant 0 : index
    %c0_19 = arith.constant 0 : index
    %c128 = arith.constant 128 : index
    %80 = vector.load %arg1[%c0_18, %c0_19, %c128] : memref<1x4x384xf32, #tpu.memory_space<vmem>>, vector<1x4x128xf32>
    %81 = vector.shape_cast %80 : vector<1x4x128xf32> to vector<4x128xf32>
    %c0_20 = arith.constant 0 : index
    %c0_21 = arith.constant 0 : index
    %c128_22 = arith.constant 128 : index
    %82 = vector.load %arg2[%c0_20, %c0_21, %c128_22] : memref<1x3x384xf32, #tpu.memory_space<vmem>>, vector<1x3x128xf32>
    %83 = vector.shape_cast %82 : vector<1x3x128xf32> to vector<3x128xf32>
    %84 = vector.extract_strided_slice %81 {offsets = [0, 0], sizes = [3, 128], strides = [1, 1]} : vector<4x128xf32> to vector<3x128xf32>
    %85 = vector.extract_strided_slice %81 {offsets = [3, 0], sizes = [1, 128], strides = [1, 1]} : vector<4x128xf32> to vector<1x128xf32>
    %86 = arith.mulf %84, %84 : vector<3x128xf32>
    %cst_23 = arith.constant dense<0.000000e+00> : vector<128xf32>
    %87 = vector.multi_reduction <add>, %86, %cst_23 [0] : vector<3x128xf32> to vector<128xf32>
    %88 = vector.shape_cast %87 : vector<128xf32> to vector<1x128xf32>
    %89 = math.rsqrt %88 : vector<1x128xf32>
    %90 = vector.broadcast %89 : vector<1x128xf32> to vector<3x128xf32>
    %91 = arith.mulf %84, %90 : vector<3x128xf32>
    %92 = arith.mulf %83, %91 : vector<3x128xf32>
    %cst_24 = arith.constant dense<0.000000e+00> : vector<128xf32>
    %93 = vector.multi_reduction <add>, %92, %cst_24 [0] : vector<3x128xf32> to vector<128xf32>
    %94 = vector.shape_cast %93 : vector<128xf32> to vector<1x128xf32>
    %95 = arith.addf %94, %85 : vector<1x128xf32>
    %cst_25 = arith.constant 2.000000e+00 : f32
    %96 = vector.broadcast %cst_25 : f32 to vector<1x128xf32>
    %97 = arith.mulf %96, %95 : vector<1x128xf32>
    %98 = vector.broadcast %97 : vector<1x128xf32> to vector<3x128xf32>
    %99 = arith.mulf %98, %91 : vector<3x128xf32>
    %100 = arith.subf %83, %99 : vector<3x128xf32>
    %cst_26 = arith.constant 8.000000e+00 : f32
    %101 = vector.broadcast %cst_26 : f32 to vector<3x128xf32>
    %102 = arith.mulf %100, %101 : vector<3x128xf32>
    %103 = math.floor %102 : vector<3x128xf32>
    %cst_27 = arith.constant 0.000000e+00 : f32
    %cst_28 = arith.constant 7.000000e+00 : f32
    %104 = vector.broadcast %cst_27 : f32 to vector<3x128xf32>
    %105 = arith.maximumf %104, %103 : vector<3x128xf32>
    %106 = vector.broadcast %cst_28 : f32 to vector<3x128xf32>
    %107 = arith.minimumf %106, %105 : vector<3x128xf32>
    %108 = arith.fptosi %107 : vector<3x128xf32> to vector<3x128xi32>
    %109 = vector.extract_strided_slice %108 {offsets = [0, 0], sizes = [1, 128], strides = [1, 1]} : vector<3x128xi32> to vector<1x128xi32>
    %c8_i32_29 = arith.constant 8 : i32
    %110 = vector.broadcast %c8_i32_29 : i32 to vector<1x128xi32>
    %111 = arith.muli %109, %110 : vector<1x128xi32>
    %112 = vector.extract_strided_slice %108 {offsets = [1, 0], sizes = [1, 128], strides = [1, 1]} : vector<3x128xi32> to vector<1x128xi32>
    %113 = arith.addi %111, %112 : vector<1x128xi32>
    %114 = vector.extract_strided_slice %108 {offsets = [2, 0], sizes = [1, 128], strides = [1, 1]} : vector<3x128xi32> to vector<1x128xi32>
    %115 = vector.broadcast %113 : vector<1x128xi32> to vector<64x128xi32>
    %116 = arith.cmpi eq, %0, %115 : vector<64x128xi32>
    %117 = arith.extui %116 : vector<64x128xi1> to vector<64x128xi32>
    %118 = arith.sitofp %117 : vector<64x128xi32> to vector<64x128xf32>
    %119 = arith.truncf %118 : vector<64x128xf32> to vector<64x128xbf16>
    %cst_30 = arith.constant dense<0.000000e+00> : vector<24x128xf32>
    %120 = tpu.matmul %5, %119, %cst_30 {dimension_numbers = #tpu.dot_dimension_numbers<[1], [0], [0], [1], [0, 0, 1, 1], [], []>} : vector<24x64xbf16>, vector<64x128xbf16>, vector<24x128xf32> -> vector<24x128xf32>
    %121 = vector.broadcast %114 : vector<1x128xi32> to vector<8x128xi32>
    %122 = arith.cmpi eq, %1, %121 : vector<8x128xi32>
    %123 = arith.extui %122 : vector<8x128xi1> to vector<8x128xi32>
    %124 = arith.sitofp %123 : vector<8x128xi32> to vector<8x128xf32>
    %125 = vector.extract_strided_slice %120 {offsets = [0, 0], sizes = [8, 128], strides = [1, 1]} : vector<24x128xf32> to vector<8x128xf32>
    %126 = arith.mulf %125, %124 : vector<8x128xf32>
    %cst_31 = arith.constant dense<0.000000e+00> : vector<128xf32>
    %127 = vector.multi_reduction <add>, %126, %cst_31 [0] : vector<8x128xf32> to vector<128xf32>
    %128 = vector.shape_cast %127 : vector<128xf32> to vector<1x128xf32>
    %129 = vector.extract_strided_slice %120 {offsets = [8, 0], sizes = [8, 128], strides = [1, 1]} : vector<24x128xf32> to vector<8x128xf32>
    %130 = arith.mulf %129, %124 : vector<8x128xf32>
    %cst_32 = arith.constant dense<0.000000e+00> : vector<128xf32>
    %131 = vector.multi_reduction <add>, %130, %cst_32 [0] : vector<8x128xf32> to vector<128xf32>
    %132 = vector.shape_cast %131 : vector<128xf32> to vector<1x128xf32>
    %133 = vector.extract_strided_slice %120 {offsets = [16, 0], sizes = [8, 128], strides = [1, 1]} : vector<24x128xf32> to vector<8x128xf32>
    %134 = arith.mulf %133, %124 : vector<8x128xf32>
    %cst_33 = arith.constant dense<0.000000e+00> : vector<128xf32>
    %135 = vector.multi_reduction <add>, %134, %cst_33 [0] : vector<8x128xf32> to vector<128xf32>
    %136 = vector.shape_cast %135 : vector<128xf32> to vector<1x128xf32>
    %137 = vector.extract_strided_slice %100 {offsets = [0, 0], sizes = [1, 128], strides = [1, 1]} : vector<3x128xf32> to vector<1x128xf32>
    %138 = arith.subf %137, %128 : vector<1x128xf32>
    %139 = vector.extract_strided_slice %100 {offsets = [1, 0], sizes = [1, 128], strides = [1, 1]} : vector<3x128xf32> to vector<1x128xf32>
    %140 = arith.subf %139, %132 : vector<1x128xf32>
    %141 = vector.extract_strided_slice %100 {offsets = [2, 0], sizes = [1, 128], strides = [1, 1]} : vector<3x128xf32> to vector<1x128xf32>
    %142 = arith.subf %141, %136 : vector<1x128xf32>
    %143 = arith.mulf %138, %138 : vector<1x128xf32>
    %144 = arith.mulf %140, %140 : vector<1x128xf32>
    %145 = arith.addf %143, %144 : vector<1x128xf32>
    %146 = arith.mulf %142, %142 : vector<1x128xf32>
    %147 = arith.addf %145, %146 : vector<1x128xf32>
    %148 = math.sqrt %147 : vector<1x128xf32>
    %c64_i32_34 = arith.constant 64 : i32
    %149 = vector.broadcast %c64_i32_34 : i32 to vector<1x128xi32>
    %150 = arith.cmpi slt, %2, %149 : vector<1x128xi32>
    %151 = arith.extui %150 : vector<1x128xi1> to vector<1x128xi32>
    %152 = arith.sitofp %151 : vector<1x128xi32> to vector<1x128xf32>
    %153 = arith.mulf %148, %152 : vector<1x128xf32>
    %c0_35 = arith.constant 0 : index
    %c0_36 = arith.constant 0 : index
    %c256 = arith.constant 256 : index
    %154 = vector.load %arg1[%c0_35, %c0_36, %c256] : memref<1x4x384xf32, #tpu.memory_space<vmem>>, vector<1x4x128xf32>
    %155 = vector.shape_cast %154 : vector<1x4x128xf32> to vector<4x128xf32>
    %c0_37 = arith.constant 0 : index
    %c0_38 = arith.constant 0 : index
    %c256_39 = arith.constant 256 : index
    %156 = vector.load %arg2[%c0_37, %c0_38, %c256_39] : memref<1x3x384xf32, #tpu.memory_space<vmem>>, vector<1x3x128xf32>
    %157 = vector.shape_cast %156 : vector<1x3x128xf32> to vector<3x128xf32>
    %158 = vector.extract_strided_slice %155 {offsets = [0, 0], sizes = [3, 128], strides = [1, 1]} : vector<4x128xf32> to vector<3x128xf32>
    %159 = vector.extract_strided_slice %155 {offsets = [3, 0], sizes = [1, 128], strides = [1, 1]} : vector<4x128xf32> to vector<1x128xf32>
    %160 = arith.mulf %158, %158 : vector<3x128xf32>
    %cst_40 = arith.constant dense<0.000000e+00> : vector<128xf32>
    %161 = vector.multi_reduction <add>, %160, %cst_40 [0] : vector<3x128xf32> to vector<128xf32>
    %162 = vector.shape_cast %161 : vector<128xf32> to vector<1x128xf32>
    %163 = math.rsqrt %162 : vector<1x128xf32>
    %164 = vector.broadcast %163 : vector<1x128xf32> to vector<3x128xf32>
    %165 = arith.mulf %158, %164 : vector<3x128xf32>
    %166 = arith.mulf %157, %165 : vector<3x128xf32>
    %cst_41 = arith.constant dense<0.000000e+00> : vector<128xf32>
    %167 = vector.multi_reduction <add>, %166, %cst_41 [0] : vector<3x128xf32> to vector<128xf32>
    %168 = vector.shape_cast %167 : vector<128xf32> to vector<1x128xf32>
    %169 = arith.addf %168, %159 : vector<1x128xf32>
    %cst_42 = arith.constant 2.000000e+00 : f32
    %170 = vector.broadcast %cst_42 : f32 to vector<1x128xf32>
    %171 = arith.mulf %170, %169 : vector<1x128xf32>
    %172 = vector.broadcast %171 : vector<1x128xf32> to vector<3x128xf32>
    %173 = arith.mulf %172, %165 : vector<3x128xf32>
    %174 = arith.subf %157, %173 : vector<3x128xf32>
    %cst_43 = arith.constant 8.000000e+00 : f32
    %175 = vector.broadcast %cst_43 : f32 to vector<3x128xf32>
    %176 = arith.mulf %174, %175 : vector<3x128xf32>
    %177 = math.floor %176 : vector<3x128xf32>
    %cst_44 = arith.constant 0.000000e+00 : f32
    %cst_45 = arith.constant 7.000000e+00 : f32
    %178 = vector.broadcast %cst_44 : f32 to vector<3x128xf32>
    %179 = arith.maximumf %178, %177 : vector<3x128xf32>
    %180 = vector.broadcast %cst_45 : f32 to vector<3x128xf32>
    %181 = arith.minimumf %180, %179 : vector<3x128xf32>
    %182 = arith.fptosi %181 : vector<3x128xf32> to vector<3x128xi32>
    %183 = vector.extract_strided_slice %182 {offsets = [0, 0], sizes = [1, 128], strides = [1, 1]} : vector<3x128xi32> to vector<1x128xi32>
    %c8_i32_46 = arith.constant 8 : i32
    %184 = vector.broadcast %c8_i32_46 : i32 to vector<1x128xi32>
    %185 = arith.muli %183, %184 : vector<1x128xi32>
    %186 = vector.extract_strided_slice %182 {offsets = [1, 0], sizes = [1, 128], strides = [1, 1]} : vector<3x128xi32> to vector<1x128xi32>
    %187 = arith.addi %185, %186 : vector<1x128xi32>
    %188 = vector.extract_strided_slice %182 {offsets = [2, 0], sizes = [1, 128], strides = [1, 1]} : vector<3x128xi32> to vector<1x128xi32>
    %189 = vector.broadcast %187 : vector<1x128xi32> to vector<64x128xi32>
    %190 = arith.cmpi eq, %0, %189 : vector<64x128xi32>
    %191 = arith.extui %190 : vector<64x128xi1> to vector<64x128xi32>
    %192 = arith.sitofp %191 : vector<64x128xi32> to vector<64x128xf32>
    %193 = arith.truncf %192 : vector<64x128xf32> to vector<64x128xbf16>
    %cst_47 = arith.constant dense<0.000000e+00> : vector<24x128xf32>
    %194 = tpu.matmul %5, %193, %cst_47 {dimension_numbers = #tpu.dot_dimension_numbers<[1], [0], [0], [1], [0, 0, 1, 1], [], []>} : vector<24x64xbf16>, vector<64x128xbf16>, vector<24x128xf32> -> vector<24x128xf32>
    %195 = vector.broadcast %188 : vector<1x128xi32> to vector<8x128xi32>
    %196 = arith.cmpi eq, %1, %195 : vector<8x128xi32>
    %197 = arith.extui %196 : vector<8x128xi1> to vector<8x128xi32>
    %198 = arith.sitofp %197 : vector<8x128xi32> to vector<8x128xf32>
    %199 = vector.extract_strided_slice %194 {offsets = [0, 0], sizes = [8, 128], strides = [1, 1]} : vector<24x128xf32> to vector<8x128xf32>
    %200 = arith.mulf %199, %198 : vector<8x128xf32>
    %cst_48 = arith.constant dense<0.000000e+00> : vector<128xf32>
    %201 = vector.multi_reduction <add>, %200, %cst_48 [0] : vector<8x128xf32> to vector<128xf32>
    %202 = vector.shape_cast %201 : vector<128xf32> to vector<1x128xf32>
    %203 = vector.extract_strided_slice %194 {offsets = [8, 0], sizes = [8, 128], strides = [1, 1]} : vector<24x128xf32> to vector<8x128xf32>
    %204 = arith.mulf %203, %198 : vector<8x128xf32>
    %cst_49 = arith.constant dense<0.000000e+00> : vector<128xf32>
    %205 = vector.multi_reduction <add>, %204, %cst_49 [0] : vector<8x128xf32> to vector<128xf32>
    %206 = vector.shape_cast %205 : vector<128xf32> to vector<1x128xf32>
    %207 = vector.extract_strided_slice %194 {offsets = [16, 0], sizes = [8, 128], strides = [1, 1]} : vector<24x128xf32> to vector<8x128xf32>
    %208 = arith.mulf %207, %198 : vector<8x128xf32>
    %cst_50 = arith.constant dense<0.000000e+00> : vector<128xf32>
    %209 = vector.multi_reduction <add>, %208, %cst_50 [0] : vector<8x128xf32> to vector<128xf32>
    %210 = vector.shape_cast %209 : vector<128xf32> to vector<1x128xf32>
    %211 = vector.extract_strided_slice %174 {offsets = [0, 0], sizes = [1, 128], strides = [1, 1]} : vector<3x128xf32> to vector<1x128xf32>
    %212 = arith.subf %211, %202 : vector<1x128xf32>
    %213 = vector.extract_strided_slice %174 {offsets = [1, 0], sizes = [1, 128], strides = [1, 1]} : vector<3x128xf32> to vector<1x128xf32>
    %214 = arith.subf %213, %206 : vector<1x128xf32>
    %215 = vector.extract_strided_slice %174 {offsets = [2, 0], sizes = [1, 128], strides = [1, 1]} : vector<3x128xf32> to vector<1x128xf32>
    %216 = arith.subf %215, %210 : vector<1x128xf32>
    %217 = arith.mulf %212, %212 : vector<1x128xf32>
    %218 = arith.mulf %214, %214 : vector<1x128xf32>
    %219 = arith.addf %217, %218 : vector<1x128xf32>
    %220 = arith.mulf %216, %216 : vector<1x128xf32>
    %221 = arith.addf %219, %220 : vector<1x128xf32>
    %222 = math.sqrt %221 : vector<1x128xf32>
    %c64_i32_51 = arith.constant 64 : i32
    %223 = vector.broadcast %c64_i32_51 : i32 to vector<1x128xi32>
    %224 = arith.cmpi slt, %2, %223 : vector<1x128xi32>
    %225 = arith.extui %224 : vector<1x128xi1> to vector<1x128xi32>
    %226 = arith.sitofp %225 : vector<1x128xi32> to vector<1x128xf32>
    %227 = arith.mulf %222, %226 : vector<1x128xf32>
    %228 = tpu.concatenate %79, %153, %227 in 1 : vector<1x128xf32>, vector<1x128xf32>, vector<1x128xf32> -> vector<1x384xf32>
    %229 = tpu.iota {dimensions = array<i32: 1>} : vector<3x384xi32>
    %230 = tpu.iota {dimensions = array<i32: 0>} : vector<3x384xi32>
    %c128_i32 = arith.constant 128 : i32
    %231 = vector.broadcast %c128_i32 : i32 to vector<3x384xi32>
    %232 = arith.muli %230, %231 : vector<3x384xi32>
    %233 = arith.cmpi sge, %229, %232 : vector<3x384xi32>
    %c1_i32 = arith.constant 1 : i32
    %234 = vector.broadcast %c1_i32 : i32 to vector<3x384xi32>
    %235 = arith.addi %230, %234 : vector<3x384xi32>
    %c128_i32_52 = arith.constant 128 : i32
    %236 = vector.broadcast %c128_i32_52 : i32 to vector<3x384xi32>
    %237 = arith.muli %235, %236 : vector<3x384xi32>
    %238 = arith.cmpi slt, %229, %237 : vector<3x384xi32>
    %239 = arith.andi %233, %238 : vector<3x384xi1>
    %240 = arith.extui %239 : vector<3x384xi1> to vector<3x384xi32>
    %241 = arith.sitofp %240 : vector<3x384xi32> to vector<3x384xf32>
    %242 = vector.broadcast %228 : vector<1x384xf32> to vector<3x384xf32>
    %243 = arith.mulf %241, %242 : vector<3x384xf32>
    %cst_53 = arith.constant dense<0.000000e+00> : vector<3xf32>
    %244 = vector.multi_reduction <add>, %243, %cst_53 [1] : vector<3x384xf32> to vector<3xf32>
    %245 = vector.shape_cast %244 : vector<3xf32> to vector<3x1xf32>
    %cst_54 = arith.constant 1.562500e-02 : f32
    %246 = vector.broadcast %cst_54 : f32 to vector<3x1xf32>
    %247 = arith.mulf %245, %246 : vector<3x1xf32>
    %c0_55 = arith.constant 0 : index
    %c0_56 = arith.constant 0 : index
    %c0_57 = arith.constant 0 : index
    %248 = vector.load %arg4[%c0_55, %c0_56, %c0_57] : memref<1x3x1xf32, #tpu.memory_space<vmem>>, vector<1x3x1xf32>
    %249 = vector.shape_cast %248 : vector<1x3x1xf32> to vector<3x1xf32>
    %250 = vector.shape_cast %247 : vector<3x1xf32> to vector<1x3x1xf32>
    tpu.vector_store %arg4[%c0_55, %c0_56, %c0_57], %250 {strides = array<i32>} : memref<1x3x1xf32, #tpu.memory_space<vmem>>, vector<1x3x1xf32>,
    return
  }
  func.func @transform_0(%arg0: i32) -> (i32, i32, i32) {
    %c0_i32 = arith.constant 0 : i32
    %c0_i32_0 = arith.constant 0 : i32
    %c0_i32_1 = arith.constant 0 : i32
    return %arg0, %c0_i32, %c0_i32_0 : i32, i32, i32
  }
  func.func @transform_1(%arg0: i32) -> (i32, i32, i32) {
    %c0_i32 = arith.constant 0 : i32
    %c0_i32_0 = arith.constant 0 : i32
    %c0_i32_1 = arith.constant 0 : i32
    return %arg0, %c0_i32, %c0_i32_0 : i32, i32, i32
  }
  func.func @transform_2(%arg0: i32) -> (i32, i32, i32, i32) {
    %c0_i32 = arith.constant 0 : i32
    %c0_i32_0 = arith.constant 0 : i32
    %c0_i32_1 = arith.constant 0 : i32
    %c0_i32_2 = arith.constant 0 : i32
    return %arg0, %c0_i32, %c0_i32_0, %c0_i32_1 : i32, i32, i32, i32
  }
  func.func @transform_3(%arg0: i32) -> (i32, i32, i32) {
    %c0_i32 = arith.constant 0 : i32
    %c0_i32_0 = arith.constant 0 : i32
    %c0_i32_1 = arith.constant 0 : i32
    return %arg0, %c0_i32, %c0_i32_0 : i32, i32, i32
  }
}

</mosaic_0001>

<bundles_post_ra>
// kernel: tpu_custom_call.1
= control target key start
LH: loop header
LB: loop body
LE: loop exit
PB: predicated region body
PF: predicated region fallthrough
CT: control target
= control target key end

     0   :  { %8 = vsyncpa [#allocation3], 0  ;;  %s1257_s0 = inlined_call_operand.vmem [shape: f32[2,4,384], index: 0, kind: input, shape index: {}]   ;;  %s1258_s1 = inlined_call_operand.vmem [shape: f32[2,3,384], index: 1, kind: input, shape index: {}]   ;;  %s1259_s2 = inlined_call_operand.hbm [shape: f32[2,1,24,64], index: 2, kind: input, shape index: {}]   ;;  %s1260_s3 = inlined_call_operand.vmem [shape: f32[2,3,1], index: 3, kind: output, shape index: {}]  }
   0x1   :  { %10 = vsyncpa [#allocation3 + $0x1], 0  ;;  %s1064_s12 = smov 0   ;;  %s1066_s13 = smov 0  }
   0x2   :  { %s1068_s14 = smov 0   ;;  %s1070_s15 = smov 0  }
   0x3 LB: > { %s1083_s16 = sadd.s32 4294967295, %s1038_s15   ;;  %s1086_s17 = sadd.s32 1, %s1038_s15   ;;  %s1038_s15 = sphi %s1070_s15, %s1270_s15   ;;  %s1034_s14 = sphi %s1068_s14, %s1269_s14   ;;  %s1030_s13 = sphi %s1066_s13, %s1268_s13   ;;  %s1026_s12 = sphi %s1064_s12, %s1267_s12  }
   0x4   : > { %s72_s18 = ssub.s32 %s1038_s15, %s1086_s17  ;;  %s75_s19 = sadd.s32 1, %s1034_s14 }
   0x5   : > { %p73_p0 = scmp.eq.s32.totalorder %s72_s18, 0  ;;  %p82_p1 = scmp.ne.s32.totalorder %s1034_s14, %s1030_s13 }
   0x6   : > { %p83_p2 = scmp.eq.s32.totalorder %s1038_s15, 0  ;;  %p88_p3 = scmp.ne.s32.totalorder %s1030_s13, %s1026_s12 }
   0x7   : > { %s1096_s20 = scalar_select %p73_p0, %s1034_s14, %s75_s19  }
   0x8   : > { %p84_p4 = por %p83_p2, %p82_p1  ;;  %p89_p5 = scmp.eq.s32.totalorder %s1083_s16, 0 }
   0x9   : > { %p925_p6 = scmp.lt.s32.totalorder %s1038_s15, 2  ;;  %s154_s22 = sand.u32 1, %s1034_s14  }
   0xa   : > { %p1100_p7 = por %p89_p5, %p88_p3  ;;  %s909_s23 = smul.u32 24, %s154_s22 }
   0xb   : > { %s910_s24 = smul.u32 24, %s1038_s15  ;;  %p1106_p8 = pnand %p925_p6, %p84_p4 }
   0xc   : > { %s158_s29 = scalar_lea.vmem [#allocation2], %s909_s23  ;;  %p829_p9 = scmp.ge.s32.totalorder %s1038_s15, 1 }
   0xd   : > { %s163_s28 = scalar_lea.hbm %s1259_s2, %s910_s24  ;;  %s166_s30 = sshll.u32 %s158_s29, 4  ;;  %s167_s30 = int_to_ptr.vmem [resolvable:$true] %s166_s30 }
   0xe   : > { %s164_s4 = sshll.u32 %s163_s28, 4  ;;  %s155_s5 = scalar_lea.sflag [#allocation3], %s154_s22  ;;  %s165_s4 = int_to_ptr.hbm [resolvable:$true] %s164_s4 }
   0xf   : > { %s974_s6 = sshra.s32 %s165_s4, 4  ;;  %p978_p11 = pneg %p1106_p8  ;;  %s975_s6 = int_to_ptr.hbm [resolvable:$true] %s974_s6 }
  0x10   : > { %s976_s7 = scalar_lea.hbm %s975_s6, 24  ;;  %s981_s10 = scalar_lea.hbm %s1259_s2, 48 }
  0x11   : > { %p977_p10 = scmp.ne.s32.totalorder %s975_s6, %s976_s7  ;;  %p982_p0 = scmp.lt.s32.totalorder %s975_s6, %s1259_s2 }
  0x12   : > { %p983_p1 = scmp.lt.s32.totalorder %s981_s10, %s976_s7 }
  0x13   : > { %p979_p12 = pnand %p978_p11, %p977_p10 }
  0x14   : > { %p984_p2 = por %p983_p1, %p982_p0 }
  0x15   : > { %p980_p13 = pneg %p979_p12 }
  0x17   : > { %p985_p3 = pnand %p984_p2, %p980_p13 }
  0x19   : > { %988 = shalt.err (!%p985_p3)
}
  0x1a   : > { %s1040_s18 = smov 128   ;;  %s1041_s19 = smov 8  }
  0x1b   : > { %924 = dma.hbm_to_vmem [thread:$0]  (!%p1106_p8), %s165_s4, 384, %s167_s30, %s155_s5, %s1040_s18, %s1040_s18, %s1041_s19  }
  0x1c   : > { %p174_p4 = scmp.lt.s32.totalorder %s1038_s15, 3 }
  0x1e   : > { %p175_p5 = pnand %p829_p9, %p174_p4 }
  0x1f   : > { %s180_s22 = sand.u32 (!%p175_p5), 1, %s1030_s13  }
  0x20   : > { %178 = sbr.rel (%p175_p5) target bundleno = 459 (0x1cb), region = 32  ;;  %s181_s24 = scalar_lea.sflag (!%p175_p5), [#allocation3], %s180_s22 }
  0x21   : > { %s911_s23 = smul.u32 (!%p175_p5), 24, %s180_s22 }
  0x23   : > { %s1128_s26 = scalar_lea.vmem (!%p175_p5), [#allocation2], %s911_s23 }
  0x25   : > { %1021 = dma.done.wait (%p1100_p7), %s181_s24, 384  }
  0x26   : > { %1023 = vsyncadd (%p1100_p7), %s181_s24, 4294966912  ;;  %p217_p6 = scmp.lt.s32.totalorder %s1083_s16, 1  ;;  %vm1261_vm0 = vcmask 1042432  }
  0x28   : > { %s1272_s16 = smov (!%p217_p6, %s1083_s16), 1 }
  0x29   : > { %s912_s15 = smul.u32 12, %s1272_s16  ;;  %s832_s4 = sshll.u32 %s1272_s16, 2 }
  0x2a   : > { %s230_s7 = scalar_lea.vmem %s1260_s3, %s832_s4 }
  0x2b   : > { %s221_s28 = scalar_lea.vmem %s1257_s0, %s912_s15  ;;  %s226_s30 = scalar_lea.vmem %s1258_s1, %s912_s15 }
  0x2c   : > { %v1144_v0 = vld [vmem:[%s221_s28] sm:$0xf]  ;;  %v1146_v1 = vld [vmem:[%s221_s28 + $0x4] sm:$0xf]  ;;  %v1152_v4 = vld [vmem:[%s221_s28 + $0x8] sm:$0xf] }
  0x2d   : > { %v250_v2 = vmul.f32 %v1144_v0, %v1144_v0  ;;  %v408_v3 = vmul.f32 %v1146_v1, %v1146_v1  ;;  %v555_v5 = vmul.f32 %v1152_v4, %v1152_v4  ;;  %v249_v44 = vld [vmem:[%s226_s30] sm:$0x7]  ;;  %v407_v48 = vld [vmem:[%s226_s30 + $0x4] sm:$0x7]  ;;  %v554_v51 = vld [vmem:[%s226_s30 + $0x8] sm:$0x7] }
  0x2f   : > { %v252_v6 = vsel %vm1261_vm0, %v250_v2, 0.0  ;;  %v409_v7 = vsel %vm1261_vm0, %v408_v3, 0.0  ;;  %v556_v10 = vsel %vm1261_vm0, %v555_v5, 0.0 }
  0x30   : > { %v253_v8 = vrot.slane %v252_v6, 4  ;;  %v410_v9 = vrot.slane %v409_v7, 4  ;;  %v557_v11 = vrot.slane %v556_v10, 4 }
  0x32   : > { %v254_v12 = vadd.f32 %v253_v8, %v252_v6  ;;  %v411_v13 = vadd.f32 %v410_v9, %v409_v7  ;;  %v558_v14 = vadd.f32 %v557_v11, %v556_v10  ;;  %v279_v11 = vperm.slane %v1144_v0, 3 }
  0x34   : > { %v255_v15 = vrot.slane %v254_v12, 2  ;;  %v412_v16 = vrot.slane %v411_v13, 2  ;;  %v559_v17 = vrot.slane %v558_v14, 2 }
  0x36   : > { %v256_v18 = vadd.f32 %v255_v15, %v254_v12  ;;  %v413_v19 = vadd.f32 %v412_v16, %v411_v13  ;;  %v560_v20 = vadd.f32 %v559_v17, %v558_v14  ;;  %v436_v14 = vperm.slane %v1146_v1, 3 }
  0x37   : > { %v583_v17 = vperm.slane %v1152_v4, 3 }
  0x38   : > { %v257_v21 = vrot.slane %v256_v18, 1  ;;  %v414_v22 = vrot.slane %v413_v19, 1  ;;  %v561_v23 = vrot.slane %v560_v20, 1 }
  0x3a   : > { %v258_v24 = vadd.f32 %v257_v21, %v256_v18  ;;  %v415_v25 = vadd.f32 %v414_v22, %v413_v19  ;;  %v562_v26 = vadd.f32 %v561_v23, %v560_v20 }
  0x3c   : > { %962 = vrsqrt.f32 %v258_v24  ;;  %vm265_vm1 = vweird.f32 %v258_v24  ;;  %vm422_vm3 = vweird.f32 %v415_v25  ;;  %vm569_vm5 = vweird.f32 %v562_v26 }
  0x3d   : > { %964 = vrsqrt.f32 %v415_v25 }
  0x3e   : > { %966 = vrsqrt.f32 %v562_v26 }
  0x42   : > { %v963_v27 = vpop.eup %962 }
  0x43   : > { %v965_v28 = vpop.eup %964  ;;  %v260_v29 = vmul.f32 %v963_v27, %v258_v24  ;;  %vm266_vm2 = vweird.f32 %v963_v27 }
  0x44   : > { %v967_v30 = vpop.eup %966  ;;  %v417_v31 = vmul.f32 %v965_v28, %v415_v25  ;;  %vm423_vm4 = vweird.f32 %v965_v28  ;;  %vm267_vm7 = vmor %vm265_vm1, %vm266_vm2 }
  0x45   : > { %v261_v32 = vmul.f32 %v963_v27, %v260_v29  ;;  %v564_v33 = vmul.f32 %v967_v30, %v562_v26  ;;  %vm570_vm6 = vweird.f32 %v967_v30  ;;  %vm424_vm8 = vmor %vm422_vm3, %vm423_vm4 }
  0x46   : > { %v418_v34 = vmul.f32 %v965_v28, %v417_v31  ;;  %vm571_vm9 = vmor %vm569_vm5, %vm570_vm6 }
  0x47   : > { %v262_v35 = vmul.f32 0.5, %v261_v32  ;;  %v565_v36 = vmul.f32 %v967_v30, %v564_v33 }
  0x48   : > { %v419_v37 = vmul.f32 0.5, %v418_v34 }
  0x49   : > { %v263_v38 = vsub.f32 1.5, %v262_v35  ;;  %v566_v39 = vmul.f32 0.5, %v565_v36  ;;  %v232_v36 = vlaneseq }
  0x4a   : > { %v420_v40 = vsub.f32 1.5, %v419_v37 }
  0x4b   : > { %v264_v41 = vmul.f32 %v963_v27, %v263_v38  ;;  %v567_v42 = vsub.f32 1.5, %v566_v39 }
  0x4c   : > { %v421_v43 = vmul.f32 %v965_v28, %v420_v40 }
  0x4d   : > { %v268_v45 = vsel %vm267_vm7, %v963_v27, %v264_v41  ;;  %v568_v46 = vmul.f32 %v967_v30, %v567_v42 }
  0x4e   : > { %v269_v47 = vmul.f32 %v268_v45, %v1144_v0  ;;  %v425_v49 = vsel %vm424_vm8, %v965_v28, %v421_v43  ;;  %v1183_v43 = vshrl.u32 %v232_v36, 7 }
  0x4f   : > { %v426_v50 = vmul.f32 %v425_v49, %v1146_v1  ;;  %v572_v52 = vsel %vm571_vm9, %v967_v30, %v568_v46 }
  0x50   : > { %v270_v53 = vmul.f32 %v269_v47, %v249_v44  ;;  %v573_v54 = vmul.f32 %v572_v52, %v1152_v4  ;;  %v240_v52 = vadd.s32 56, %v1183_v43 }
  0x51   : > { %v427_v55 = vmul.f32 %v426_v50, %v407_v48 }
  0x52   : > { %v271_v56 = vsel %vm1261_vm0, %v270_v53, 0.0  ;;  %v574_v57 = vmul.f32 %v573_v54, %v554_v51 }
  0x53   : > { %v272_v58 = vrot.slane %v271_v56, 4  ;;  %v428_v59 = vsel %vm1261_vm0, %v427_v55, 0.0 }
  0x54   : > { %v429_v60 = vrot.slane %v428_v59, 4  ;;  %v575_v61 = vsel %vm1261_vm0, %v574_v57, 0.0 }
  0x55   : > { %v273_v62 = vadd.f32 %v272_v58, %v271_v56  ;;  %v576_v63 = vrot.slane %v575_v61, 4  ;;  %v237_v58 = vadd.s32 32, %v1183_v43 }
  0x56   : > { %v430_v2 = vadd.f32 %v429_v60, %v428_v59  ;;  %v238_v60 = vadd.s32 40, %v1183_v43 }
  0x57   : > { %v274_v3 = vrot.slane %v273_v62, 2  ;;  %v577_v5 = vadd.f32 %v576_v63, %v575_v61 }
  0x58   : > { %v431_v6 = vrot.slane %v430_v2, 2 }
  0x59   : > { %v275_v7 = vadd.f32 %v274_v3, %v273_v62  ;;  %v578_v8 = vrot.slane %v577_v5, 2  ;;  %v236_v3 = vadd.s32 24, %v1183_v43 }
  0x5a   : > { %v432_v9 = vadd.f32 %v431_v6, %v430_v2  ;;  %v235_v2 = vadd.s32 16, %v1183_v43  ;;  %v1042_v6 = vmov 1.0|1.0  }
  0x5b   : > { %v276_v10 = vrot.slane %v275_v7, 1  ;;  %v579_v12 = vadd.f32 %v578_v8, %v577_v5  ;;  %v243_v8 = vld [vmem:[%s1128_s26] sm:$0xff] }
  0x5c   : > { %v433_v13 = vrot.slane %v432_v9, 1 }
  0x5d   : > { %v277_v15 = vadd.f32 %v276_v10, %v275_v7  ;;  %v580_v16 = vrot.slane %v579_v12, 1  ;;  %v234_v7 = vadd.s32 8, %v1183_v43  ;;  %v245_v10 = vld [vmem:[%s1128_s26 + $0x10] sm:$0xff] }
  0x5e   : > { %v434_v18 = vadd.f32 %v433_v13, %v432_v9  ;;  %v244_v9 = vld [vmem:[%s1128_s26 + $0x8] sm:$0xff] }
  0x5f   : > { %v281_v19 = vadd.f32 %v279_v11, %v277_v15  ;;  %v581_v20 = vadd.f32 %v580_v16, %v579_v12  ;;  %v246_v11 = vpack.c.bf16 %v244_v9, %v243_v8  ;;  %v247_v12 = vpack.c.bf16 %v245_v10, %v245_v10 }
  0x60   : > { %v438_v21 = vadd.f32 %v436_v14, %v434_v18  ;;  %v1043_v15 = vmov 0.0  }
  0x61   : > { %v282_v22 = vmul.f32 2.0, %v281_v19  ;;  %v585_v23 = vadd.f32 %v583_v17, %v581_v20 }
  0x62   : > { %v439_v24 = vmul.f32 2.0, %v438_v21 }
  0x63   : > { %v283_v25 = vperm.slane %v282_v22, 0  ;;  %v586_v26 = vmul.f32 2.0, %v585_v23 }
  0x64   : > { %v440_v27 = vperm.slane %v439_v24, 0 }
  0x65   : > { %v284_v28 = vmul.f32 %v283_v25, %v269_v47  ;;  %v587_v0 = vperm.slane %v586_v26, 0 }
  0x66   : > { %v441_v29 = vmul.f32 %v440_v27, %v426_v50 }
  0x67   : > { %v1173_v30 = vsub.f32 %v249_v44, %v284_v28  ;;  %v588_v1 = vmul.f32 %v587_v0, %v573_v54 }
  0x68   : > { %v1175_v31 = vsub.f32 %v407_v48, %v441_v29 }
  0x69   : > { %v286_v4 = vmul.f32 8.0, %v1173_v30  ;;  %v1178_v32 = vsub.f32 %v554_v51, %v588_v1  ;;  %v239_v51 = vadd.s32 48, %v1183_v43 }
  0x6a   : > { %v443_v33 = vmul.f32 8.0, %v1175_v31 }
  0x6b   : > { %v287_v34 = vfloor.f32 %v286_v4  ;;  %v590_v35 = vmul.f32 8.0, %v1178_v32 }
  0x6c   : > { %v444_v37 = vfloor.f32 %v443_v33 }
  0x6d   : > { %v288_v38 = vmax.f32 %v287_v34, 0.0  ;;  %v591_v39 = vfloor.f32 %v590_v35 }
  0x6e   : > { %v445_v40 = vmax.f32 %v444_v37, 0.0 }
  0x6f   : > { %v289_v41 = vmin.f32 %v288_v38, 7.0  ;;  %v592_v42 = vmax.f32 %v591_v39, 0.0 }
  0x70   : > { %v446_v44 = vmin.f32 %v445_v40, 7.0 }
  0x71   : > { %v1185_v45 = vcvt.f32.s32 %v289_v41  ;;  %v593_v46 = vmin.f32 %v592_v42, 7.0 }
  0x72   : > { %v1187_v47 = vcvt.f32.s32 %v446_v44 }
  0x73   : > { %v291_v48 = vmul.u32 8, %v1185_v45  ;;  %v833_v49 = vrot.slane %v1185_v45, 9  ;;  %v1191_v50 = vcvt.f32.s32 %v593_v46  ;;  %v349_v13 = vperm.slane %v1185_v45, 2 }
  0x74   : > { %v448_v53 = vmul.u32 8, %v1187_v47  ;;  %v856_v54 = vrot.slane %v1187_v47, 9  ;;  %v499_v14 = vperm.slane %v1187_v47, 2 }
  0x75   : > { %v294_v55 = vadd.s32 %v833_v49, %v291_v48  ;;  %v595_v56 = vmul.u32 8, %v1191_v50  ;;  %v878_v57 = vrot.slane %v1191_v50, 9  ;;  %v646_v18 = vperm.slane %v1191_v50, 2 }
  0x76   : > { %v451_v59 = vadd.s32 %v856_v54, %v448_v53 }
  0x77   : > { %v295_v61 = vperm.slane %v294_v55, 0  ;;  %v598_v62 = vadd.s32 %v878_v57, %v595_v56 }
  0x78   : > { %v452_v63 = vperm.slane %v451_v59, 0 }
  0x79   : > { %vm302_vm10 = vcmp.eq.s32.totalorder %v239_v51, %v295_v61  ;;  %vm303_vm11 = vcmp.eq.s32.totalorder %v240_v52, %v295_v61  ;;  %v599_v5 = vperm.slane %v598_v62, 0  ;;  %vm300_vm12 = vcmp.eq.s32.totalorder %v237_v58, %v295_v61 }
  0x7a   : > { %vm842_vm13 = vmpackc.low %vm303_vm11, %vm302_vm10  ;;  %vm459_vm14 = vcmp.eq.s32.totalorder %v239_v51, %v452_v63  ;;  %vm460_vm15 = vcmp.eq.s32.totalorder %v240_v52, %v452_v63  ;;  %vm301_vm1 = vcmp.eq.s32.totalorder %v238_v60, %v295_v61  ;;  %vm457_vm2 = vcmp.eq.s32.totalorder %v237_v58, %v452_v63 }
  0x7b   : > { %843 = vmatpush.bf16.msk.msra.mxu0 %vm842_vm13, %v1042_v6  ;;  %vm865_vm3 = vmpackc.low %vm460_vm15, %vm459_vm14  ;;  %vm606_vm4 = vcmp.eq.s32.totalorder %v239_v51, %v599_v5  ;;  %vm607_vm5 = vcmp.eq.s32.totalorder %v240_v52, %v599_v5  ;;  %905 = vmatpush.bf16.msk.msra.mxu3 %vm842_vm13, %v1042_v6  ;;  %vm458_vm6 = vcmp.eq.s32.totalorder %v238_v60, %v452_v63 }
  0x7c   : > { %866 = vmatpush.bf16.msk.msra.mxu1 %vm865_vm3, %v1042_v6  ;;  %vm887_vm7 = vmpackc.low %vm607_vm5, %vm606_vm4  ;;  %vm604_vm8 = vcmp.eq.s32.totalorder %v237_v58, %v599_v5  ;;  %vm605_vm9 = vcmp.eq.s32.totalorder %v238_v60, %v599_v5  ;;  %vm298_vm10 = vcmp.eq.s32.totalorder %v235_v2, %v295_v61  ;;  %vm299_vm11 = vcmp.eq.s32.totalorder %v236_v3, %v295_v61 }
  0x7d   : > { %888 = vmatpush.bf16.msk.msra.mxu2 %vm887_vm7, %v1042_v6  ;;  %vm844_vm0 = vmpackc.low %vm301_vm1, %vm300_vm12  ;;  %vm455_vm15 = vcmp.eq.s32.totalorder %v235_v2, %v452_v63  ;;  %vm456_vm13 = vcmp.eq.s32.totalorder %v236_v3, %v452_v63  ;;  %vm602_vm4 = vcmp.eq.s32.totalorder %v235_v2, %v599_v5  ;;  %vm603_vm5 = vcmp.eq.s32.totalorder %v236_v3, %v599_v5 }
  0x7e   : > { %vm867_vm14 = vmpackc.low %vm458_vm6, %vm457_vm2  ;;  %vm296_vm1 = vcmp.eq.s32.totalorder %v1183_v43, %v295_v61  ;;  %vm297_vm2 = vcmp.eq.s32.totalorder %v234_v7, %v295_v61 }
  0x7f   : > { %845 = vmatpush.bf16.msk.msra.mxu0 %vm844_vm0, %v1042_v6  ;;  %vm889_vm3 = vmpackc.low %vm605_vm9, %vm604_vm8  ;;  %906 = vmatpush.bf16.msk.msra.mxu3 %vm844_vm0, %v1042_v6  ;;  %vm453_vm8 = vcmp.eq.s32.totalorder %v1183_v43, %v452_v63  ;;  %vm454_vm9 = vcmp.eq.s32.totalorder %v234_v7, %v452_v63  ;;  %vm600_vm0 = vcmp.eq.s32.totalorder %v1183_v43, %v599_v5 }
  0x80   : > { %868 = vmatpush.bf16.msk.msra.mxu1 %vm867_vm14, %v1042_v6  ;;  %vm846_vm7 = vmpackc.low %vm299_vm11, %vm298_vm10  ;;  %vm601_vm14 = vcmp.eq.s32.totalorder %v234_v7, %v599_v5 }
  0x81   : > { %890 = vmatpush.bf16.msk.msra.mxu2 %vm889_vm3, %v1042_v6  ;;  %vm869_vm12 = vmpackc.low %vm456_vm13, %vm455_vm15  ;;  %vm324_vm13 = vcmask 523264   ;;  %vm350_vm3 = vcmp.eq.s32.totalorder %v1183_v43, %v349_v13 }
  0x82   : > { %vm891_vm6 = vmpackc.low %vm603_vm5, %vm602_vm4  ;;  %vm500_vm4 = vcmp.eq.s32.totalorder %v1183_v43, %v499_v14  ;;  %v852_v16 = vsel %vm350_vm3, 1.0, %v1043_v15  ;;  %vm647_vm5 = vcmp.eq.s32.totalorder %v1183_v43, %v646_v18 }
  0x83   : > { %847 = vmatpush.bf16.msk.msra.mxu0 %vm846_vm7, %v1042_v6  ;;  %907 = vmatpush.bf16.msk.msra.mxu3 %vm846_vm7, %v1042_v6  ;;  %vm848_vm10 = vmpackc.low %vm297_vm2, %vm296_vm1  ;;  %v875_v17 = vsel %vm500_vm4, 1.0, %v1043_v15  ;;  %v897_v26 = vsel %vm647_vm5, 1.0, %v1043_v15 }
  0x84   : > { %870 = vmatpush.bf16.msk.msra.mxu1 %vm869_vm12, %v1042_v6  ;;  %vm871_vm11 = vmpackc.low %vm454_vm9, %vm453_vm8 }
  0x85   : > { %892 = vmatpush.bf16.msk.msra.mxu2 %vm891_vm6, %v1042_v6  ;;  %vm893_vm15 = vmpackc.low %vm601_vm14, %vm600_vm0 }
  0x87   : > { %849 = vmatpush.bf16.msk.msra.mxu0 %vm848_vm10, %v1042_v6  ;;  %908 = vmatpush.bf16.msk.msra.mxu3 %vm848_vm10, %v1042_v6 }
  0x88   : > { %872 = vmatpush.bf16.msk.msra.mxu1 %vm871_vm11, %v1042_v6 }
  0x89   : > { %894 = vmatpush.bf16.msk.msra.mxu2 %vm893_vm15, %v1042_v6 }
  0x8a   : > { %850 = vmatmul.msk.bf16.vlgmr.msra.gmra.mxu0 %vm324_vm13, %v246_v11  ;;  %851 = vmatmul.msk.bf16.vlgmr.msra.gmra.mxu3 %vm324_vm13, %v247_v12 }
  0x8b   : > { %873 = vmatmul.msk.bf16.vlgmr.msra.gmra.mxu1 %vm324_vm13, %v246_v11 }
  0x8c   : > { %895 = vmatmul.msk.bf16.vlgmr.msra.gmra.mxu2 %vm324_vm13, %v246_v11 }
  0x9b   : > { %874 = vmatmul.msk.bf16.gmra.mxu1 %vm324_vm13, %v247_v12 }
  0x9c   : > { %896 = vmatmul.msk.bf16.gmra.mxu2 %vm324_vm13, %v247_v12 }
 0x107   : > { %v340_v19 = vpop.f32.mrf.mxu0 }
 0x108   : > { %v353_v20 = vmul.f32 %v852_v16, %v340_v19  ;;  %v490_v21 = vpop.f32.mrf.mxu1 }
 0x109   : > { %v503_v22 = vmul.f32 %v875_v17, %v490_v21 }
 0x10a   : > { %v354_v23 = vrot.slane %v353_v20, 4 }
 0x10b   : > { %v504_v25 = vrot.slane %v503_v22, 4 }
 0x10c   : > { %v355_v24 = vadd.f32 %v354_v23, %v353_v20 }
 0x10d   : > { %v345_v27 = vpop.f32.mrf.mxu3  ;;  %v505_v37 = vadd.f32 %v504_v25, %v503_v22 }
 0x10e   : > { %v356_v28 = vrot.slane %v355_v24, 2  ;;  %v367_v0 = vmul.f32 %v852_v16, %v345_v27 }
 0x10f   : > { %v637_v29 = vpop.f32.mrf.mxu2  ;;  %v342_v1 = vpop.f32.mrf.mxu0  ;;  %v506_v47 = vrot.slane %v505_v37, 2 }
 0x110   : > { %v650_v4 = vmul.f32 %v897_v26, %v637_v29  ;;  %v360_v33 = vmul.f32 %v852_v16, %v342_v1  ;;  %v492_v34 = vpop.f32.mrf.mxu1  ;;  %v368_v35 = vrot.slane %v367_v0, 4  ;;  %v357_v39 = vadd.f32 %v356_v28, %v355_v24 }
 0x111   : > { %v510_v38 = vmul.f32 %v875_v17, %v492_v34  ;;  %v507_v59 = vadd.f32 %v506_v47, %v505_v37 }
 0x112   : > { %v361_v40 = vrot.slane %v360_v33, 4  ;;  %v369_v41 = vadd.f32 %v368_v35, %v367_v0  ;;  %v651_v44 = vrot.slane %v650_v4, 4  ;;  %v358_v50 = vrot.slane %v357_v39, 1 }
 0x113   : > { %v511_v42 = vrot.slane %v510_v38, 4  ;;  %v508_v11 = vrot.slane %v507_v59, 1 }
 0x114   : > { %v362_v45 = vadd.f32 %v361_v40, %v360_v33  ;;  %v370_v46 = vrot.slane %v369_v41, 2  ;;  %v652_v55 = vadd.f32 %v651_v44, %v650_v4  ;;  %v359_v63 = vadd.f32 %v358_v50, %v357_v39 }
 0x115   : > { %v512_v48 = vadd.f32 %v511_v42, %v510_v38  ;;  %v347_v49 = vpop.f32.mrf.mxu3  ;;  %v509_v28 = vadd.f32 %v508_v11, %v507_v59 }
 0x116   : > { %v363_v51 = vrot.slane %v362_v45, 2  ;;  %v371_v52 = vadd.f32 %v370_v46, %v369_v41  ;;  %v653_v8 = vrot.slane %v652_v55, 2  ;;  %v374_v16 = vsub.f32 %v1173_v30, %v359_v63 }
 0x117   : > { %v513_v53 = vrot.slane %v512_v48, 2  ;;  %v639_v54 = vpop.f32.mrf.mxu2  ;;  %v524_v41 = vsub.f32 %v1175_v31, %v509_v28 }
 0x118   : > { %v364_v56 = vadd.f32 %v363_v51, %v362_v45  ;;  %v372_v57 = vrot.slane %v371_v52, 1  ;;  %v495_v58 = vpop.f32.mrf.mxu1  ;;  %v657_v61 = vmul.f32 %v897_v26, %v639_v54  ;;  %v654_v23 = vadd.f32 %v653_v8, %v652_v55 }
 0x119   : > { %v514_v60 = vadd.f32 %v513_v53, %v512_v48  ;;  %v517_v62 = vmul.f32 %v875_v17, %v495_v58  ;;  %v377_v1 = vmul.f32 %v374_v16, %v374_v16 }
 0x11a   : > { %v365_v2 = vrot.slane %v364_v56, 1  ;;  %v373_v3 = vadd.f32 %v372_v57, %v371_v52  ;;  %v658_v6 = vrot.slane %v657_v61, 4  ;;  %v655_v38 = vrot.slane %v654_v23, 1 }
 0x11b   : > { %v515_v5 = vrot.slane %v514_v60, 1  ;;  %v518_v7 = vrot.slane %v517_v62, 4  ;;  %v527_v52 = vmul.f32 %v524_v41, %v524_v41 }
 0x11c   : > { %v366_v9 = vadd.f32 %v365_v2, %v364_v56  ;;  %v376_v10 = vsub.f32 %v1173_v30, %v373_v3  ;;  %v659_v13 = vadd.f32 %v658_v6, %v657_v61  ;;  %v656_v50 = vadd.f32 %v655_v38, %v654_v23 }
 0x11d   : > { %v516_v12 = vadd.f32 %v515_v5, %v514_v60  ;;  %v519_v14 = vadd.f32 %v518_v7, %v517_v62 }
 0x11e   : > { %v375_v18 = vsub.f32 %v1173_v30, %v366_v9  ;;  %v384_v19 = vmul.f32 %v376_v10, %v376_v10  ;;  %v660_v20 = vrot.slane %v659_v13, 2  ;;  %v671_v58 = vsub.f32 %v1178_v32, %v656_v50 }
 0x11f   : > { %v525_v17 = vsub.f32 %v1175_v31, %v516_v12  ;;  %v520_v21 = vrot.slane %v519_v14, 2  ;;  %v642_v22 = vpop.f32.mrf.mxu2 }
 0x120   : > { %v378_v24 = vmul.f32 %v375_v18, %v375_v18  ;;  %v664_v25 = vmul.f32 %v897_v26, %v642_v22  ;;  %v497_v27 = vpop.f32.mrf.mxu1  ;;  %v661_v0 = vadd.f32 %v660_v20, %v659_v13  ;;  %v854_v33 = vrot.slane %v384_v19, 10 }
 0x121   : > { %v521_v29 = vadd.f32 %v520_v21, %v519_v14  ;;  %v528_v35 = vmul.f32 %v525_v17, %v525_v17  ;;  %v242_v14 = vand.u32 127, %v232_v36 }
 0x122   : > { %v853_v4 = vrot.slane %v378_v24, 9  ;;  %v665_v34 = vrot.slane %v664_v25, 4  ;;  %v662_v37 = vrot.slane %v661_v0, 1  ;;  %v702_v24 = vmul.u32 128, %v1183_v43 }
 0x123   : > { %v522_v30 = vrot.slane %v521_v29, 1  ;;  %v876_v46 = vrot.slane %v528_v35, 9  ;;  %vm402_vm12 = vcmp.lt.s32.totalorder %v242_v14, 64  ;;  %v700_v21 = vadd.s32 128, %v242_v14 }
 0x124   : > { %v383_v39 = vadd.f32 %v853_v4, %v377_v1  ;;  %v666_v40 = vadd.f32 %v665_v34, %v664_v25  ;;  %v663_v42 = vadd.f32 %v662_v37, %v661_v0  ;;  %v855_v36 = vsel %vm402_vm12, 1.0, %v1043_v15 }
 0x125   : > { %v523_v44 = vadd.f32 %v522_v30, %v521_v29  ;;  %v533_v56 = vadd.f32 %v876_v46, %v527_v52  ;;  %vm704_vm2 = vcmp.ge.s32.totalorder %v700_v21, %v702_v24  ;;  %vm703_vm9 = vcmp.ge.s32.totalorder %v242_v14, %v702_v24 }
 0x126   : > { %v389_v45 = vadd.f32 %v854_v33, %v383_v39  ;;  %v667_v26 = vrot.slane %v666_v40, 2  ;;  %v672_v47 = vsub.f32 %v1178_v32, %v663_v42  ;;  %v701_v35 = vadd.s32 256, %v242_v14 }
 0x127   : > { %v526_v48 = vsub.f32 %v1175_v31, %v523_v44  ;;  %v644_v49 = vpop.f32.mrf.mxu2  ;;  %v674_v31 = vmul.f32 %v671_v58, %v671_v58 }
 0x128   : > { %v668_v51 = vadd.f32 %v667_v26, %v666_v40  ;;  %968 = vrsqrt.f32 %v389_v45  ;;  %v675_v54 = vmul.f32 %v672_v47, %v672_v47  ;;  %vm397_vm7 = vcmp.eq.f32.partialorder %v389_v45, inf }
 0x129   : > { %v534_v53 = vmul.f32 %v526_v48, %v526_v48  ;;  %v400_v25 = vand.u32 2147483648, %v389_v45  ;;  %vm399_vm1 = vcmp.eq.f32.partialorder %v389_v45, 0.0  ;;  %vm705_vm15 = vcmp.ge.s32.totalorder %v701_v35, %v702_v24 }
 0x12a   : > { %v669_v55 = vrot.slane %v668_v51, 1  ;;  %v898_v62 = vrot.slane %v675_v54, 9 }
 0x12b   : > { %v877_v57 = vrot.slane %v534_v53, 10 }
 0x12c   : > { %v670_v59 = vadd.f32 %v669_v55, %v668_v51  ;;  %v680_v6 = vadd.f32 %v898_v62, %v674_v31 }
 0x12d   : > { %v539_v60 = vadd.f32 %v877_v57, %v533_v56 }
 0x12e   : > { %v969_v61 = vpop.eup %968  ;;  %v673_v63 = vsub.f32 %v1178_v32, %v670_v59  ;;  %v706_v32 = vadd.s32 1, %v1183_v43 }
 0x12f   : > { %v391_v2 = vmul.f32 %v969_v61, %v389_v45  ;;  %970 = vrsqrt.f32 %v539_v60  ;;  %vm547_vm8 = vcmp.eq.f32.partialorder %v539_v60, inf  ;;  %v550_v4 = vand.u32 2147483648, %v539_v60 }
 0x130   : > { %v681_v3 = vmul.f32 %v673_v63, %v673_v63  ;;  %v707_v28 = vmul.u32 128, %v706_v32  ;;  %vm549_vm0 = vcmp.eq.f32.partialorder %v539_v60, 0.0 }
 0x131   : > { %v392_v5 = vmul.f32 %v969_v61, %v391_v2 }
 0x132   : > { %v899_v7 = vrot.slane %v681_v3, 10  ;;  %vm709_vm6 = vcmp.lt.s32.totalorder %v700_v21, %v707_v28  ;;  %vm708_vm14 = vcmp.lt.s32.totalorder %v242_v14, %v707_v28  ;;  %vm710_vm13 = vcmp.lt.s32.totalorder %v701_v35, %v707_v28 }
 0x133   : > { %v393_v8 = vmul.f32 0.5, %v392_v5  ;;  %vm712_vm10 = vmand %vm704_vm2, %vm709_vm6  ;;  %vm734_vm2 = vcmask 2048  }
 0x134   : > { %v686_v9 = vadd.f32 %v899_v7, %v680_v6  ;;  %vm711_vm11 = vmand %vm703_vm9, %vm708_vm14  ;;  %v901_v40 = vsel %vm712_vm10, 1.0, %v1043_v15 }
 0x135   : > { %v971_v10 = vpop.eup %970  ;;  %v394_v11 = vsub.f32 1.5, %v393_v8  ;;  %v900_v26 = vsel %vm711_vm11, 1.0, %v1043_v15  ;;  %vm713_vm5 = vmand %vm705_vm15, %vm710_vm13 }
 0x136   : > { %v541_v12 = vmul.f32 %v971_v10, %v539_v60  ;;  %972 = vrsqrt.f32 %v686_v9  ;;  %vm694_vm3 = vcmp.eq.f32.partialorder %v686_v9, inf  ;;  %vm696_vm4 = vcmp.eq.f32.partialorder %v686_v9, 0.0 }
 0x137   : > { %v395_v13 = vmul.f32 %v969_v61, %v394_v11  ;;  %v902_v51 = vsel %vm713_vm5, 1.0, %v1043_v15 }
 0x138   : > { %v542_v16 = vmul.f32 %v971_v10, %v541_v12 }
 0x139   : > { %v396_v18 = vmul.f32 %v395_v13, %v389_v45 }
 0x13a   : > { %v543_v19 = vmul.f32 0.5, %v542_v16 }
 0x13b   : > { %v398_v22 = vsel %vm397_vm7, %v389_v45, %v396_v18  ;;  %v697_v45 = vand.u32 2147483648, %v686_v9  ;;  %vm1264_vm7 = vcmask 1042432  }
 0x13c   : > { %v973_v17 = vpop.eup %972  ;;  %v544_v20 = vsub.f32 1.5, %v543_v19  ;;  %v401_v29 = vsel %vm399_vm1, %v400_v25, %v398_v22  ;;  %vm1265_vm12 = vmmov %vm1264_vm7 }
 0x13d   : > { %v688_v23 = vmul.f32 %v973_v17, %v686_v9  ;;  %v405_v43 = vmul.f32 %v855_v36, %v401_v29  ;;  %vm1266_vm1 = vmmov %vm1264_vm7 }
 0x13e   : > { %v545_v27 = vmul.f32 %v971_v10, %v544_v20 }
 0x13f   : > { %v689_v0 = vmul.f32 %v973_v17, %v688_v23  ;;  %v720_v44 = vperm.slane %v405_v43, 0 }
 0x140   : > { %v546_v1 = vmul.f32 %v545_v27, %v539_v60 }
 0x141   : > { %v690_v33 = vmul.f32 0.5, %v689_v0  ;;  %v723_v50 = vmul.f32 %v900_v26, %v720_v44 }
 0x142   : > { %v548_v34 = vsel %vm547_vm8, %v539_v60, %v546_v1 }
 0x143   : > { %v551_v37 = vsel %vm549_vm0, %v550_v4, %v548_v34  ;;  %v691_v30 = vsub.f32 1.5, %v690_v33  ;;  %v726_v55 = vsel %vm1265_vm12, %v723_v50, 0.0 }
 0x144   : > { %v552_v38 = vmul.f32 %v855_v36, %v551_v37 }
 0x145   : > { %v692_v39 = vmul.f32 %v973_v17, %v691_v30 }
 0x146   : > { %v721_v41 = vperm.slane %v552_v38, 0 }
 0x147   : > { %v693_v42 = vmul.f32 %v692_v39, %v686_v9 }
 0x148   : > { %v724_v47 = vmul.f32 %v901_v40, %v721_v41 }
 0x149   : > { %v695_v46 = vsel %vm694_vm3, %v686_v9, %v693_v42 }
 0x14a   : > { %v698_v48 = vsel %vm696_vm4, %v697_v45, %v695_v46  ;;  %v727_v53 = vsel %vm1264_vm7, %v724_v47, 0.0 }
 0x14b   : > { %v699_v49 = vmul.f32 %v855_v36, %v698_v48  ;;  %v728_v56 = vadd.f32 %v727_v53, %v726_v55 }
 0x14d   : > { %v722_v52 = vperm.slane %v699_v49, 0 }
 0x14f   : > { %v725_v54 = vmul.f32 %v902_v51, %v722_v52 }
 0x151   : > { %v729_v57 = vsel %vm1266_vm1, %v725_v54, 0.0 }
 0x152   : > { %v730_v58 = vadd.f32 %v729_v57, %v728_v56 }
 0x154   : > { %731 = vadd.xlane.f32.xlu0 %v730_v58 }
 0x1c7   : > { %v732_v59 = vpop.xlane.xlu0 %731 }
 0x1c8   : > { %v733_v60 = vmul.f32 0.015625, %v732_v59 }
 0x1ca   : > { %735 = vst.msk [vmem:[%s230_s7] sm:$0x7] %vm734_vm2, %v733_v60 }
 0x1cb PF: > { %p13_p7 = scmp.ge.s32.totalorder %s1086_s17, 4   ;;  %s1267_s12 = smov %s1030_s13 }
 0x1cc   : > { %s1268_s13 = smov %s1034_s14  ;;  %s1269_s14 = smov %s1096_s20 }
 0x1cd   : > { %s1270_s15 = smov %s1086_s17  ;;  %15 = sbr.rel (!%p13_p7) target bundleno = 3 (0x3), region = 78 }
 0x1d2   :  { %755 = vsyncpa [#allocation3], 1 }
 0x1d3   :  { %757 = vsyncpa [#allocation3 + $0x1], 1 }

</bundles_post_ra>
